<compile_context>
chip_gen: v5e
topology: v5e:2x2
jax: 0.10.0
libtpu: 0.0.40
codegen_flags: <defaults>
</compile_context>

<pallas_src>
import functools

import jax
import jax.numpy as jnp
from jax.experimental import pallas as pl
from jax.experimental.pallas import tpu as pltpu


def _layernorm(x, gamma, beta, eps=1e-5):
    mean = jnp.mean(x, axis=-1, keepdims=True)
    xc = x - mean                                   # reuse the centered tensor
    var = jnp.mean(xc * xc, axis=-1, keepdims=True)
    return xc * jax.lax.rsqrt(var + eps) * gamma + beta


def encoder_layer_kernel(x_ref, wattn_ref, bias_ref, ef_ref, mask_ref, ffn_ref,
                         o_ref, *, d_model, dim_ff, bhk):
    """Single-invocation encoder layer over all B*S tokens.

    x_ref     : [N, D] f32            (N = B*S flattened tokens)
    wattn_ref : [D, 4D] bf16          (wq*scale | wk | wv | wo)
    bias_ref  : [8, max(3D,dff)] f32  rows: qkv-bias | bo | b2 | g1 | be1 | g2 | be2 | b1
    ef_ref    : [N, 2*BHK] bf16       (batch-block-diag E expanded over heads | same for F)
    mask_ref  : [D+BHK+N, max(D,BHK)] bf16  rows: k_mask | v_mask (= per-head sum matrix) | add_mask
    ffn_ref   : [D+dff, max(D,dff)] bf16    rows: w1 | w2
    o_ref     : [N, D] f32
    """
    D = d_model
    dff = dim_ff

    x = x_ref[...]                                  # [N, D] f32
    xb = x.astype(jnp.bfloat16)

    # --- fused QKV projection (scale already folded into the Q columns/bias) --
    qkv = jnp.dot(xb, wattn_ref[:, :3 * D],
                  preferred_element_type=jnp.float32) + bias_ref[0:1, :3 * D]  # [N, 3D]
    q = qkv[:, :D].astype(jnp.bfloat16)
    k = qkv[:, D:2 * D].astype(jnp.bfloat16)
    v = qkv[:, 2 * D:3 * D].astype(jnp.bfloat16)

    # --- Linformer projections for all batches at once ------------------------
    #   kpT[d, (b,h,j)] = sum_s K_b[s, d] * E[s, j]   (replicated over h by construction)
    #   vp [(b,h,j), d] = sum_s F[s, j] * V_b[s, d]
    kpT = jax.lax.dot_general(k, ef_ref[:, :bhk], (((0,), (0,)), ((), ())),
                              preferred_element_type=jnp.float32)             # [D, BHK]
    vp = jax.lax.dot_general(ef_ref[:, bhk:], v, (((0,), (0,)), ((), ())),
                             preferred_element_type=jnp.float32)              # [BHK, D]

    # --- precomputed static masks ---------------------------------------------
    k_mask = mask_ref[:D, :bhk]                     # [D, BHK]   0/1 head block mask
    v_mask = mask_ref[D:D + bhk, :D]                # [BHK, D]   0/1 (doubles as per-head sum matrix)
    add_mask = mask_ref[D + bhk:, :bhk]             # [N, BHK]   0 / -1e9 cross-batch mask

    k_big = (kpT * k_mask).astype(jnp.bfloat16)     # block-diagonal over heads
    v_big = (vp * v_mask).astype(jnp.bfloat16)

    # --- scores + softmax (row-global max is exact; cross-batch cols -> exp=0) -
    scores = jnp.dot(q, k_big, preferred_element_type=jnp.float32) + add_mask  # [N, BHK]
    scores = scores - jnp.max(scores, axis=-1, keepdims=True)
    p = jnp.exp(scores).astype(jnp.bfloat16)

    # --- context + per-head denominator (v_mask is the summation matrix) ------
    ctx_un = jnp.dot(p, v_big, preferred_element_type=jnp.float32)             # [N, D]
    denom = jnp.dot(p, v_mask, preferred_element_type=jnp.float32)             # [N, D]
    ctx = ctx_un * pl.reciprocal(denom + 1e-30, approx=True)

    attn = jnp.dot(ctx.astype(jnp.bfloat16), wattn_ref[:, 3 * D:],
                   preferred_element_type=jnp.float32) + bias_ref[1:2, :D]

    # --- residual + norm1 (dropout = identity at inference) -------------------
    h1 = _layernorm(x + attn, bias_ref[3:4, :D], bias_ref[4:5, :D])

    # --- feedforward: Linear -> ReLU -> Linear ---------------------------------
    ff = jnp.dot(h1.astype(jnp.bfloat16), ffn_ref[:D, :dff],
                 preferred_element_type=jnp.float32) + bias_ref[7:8, :dff]
    ff = jnp.maximum(ff, 0.0)
    ff = jnp.dot(ff.astype(jnp.bfloat16), ffn_ref[D:, :D],
                 preferred_element_type=jnp.float32) + bias_ref[2:3, :D]

    # --- residual + norm2 -------------------------------------------------------
    o_ref[...] = _layernorm(h1 + ff, bias_ref[5:6, :D], bias_ref[6:7, :D])


def sign_language_encoder_layer(x, params, num_heads):
    """x: [B, S, D] float32. params: flat list of parameter arrays (see __main__)."""
    B, S, D = x.shape
    (wq, bq, wk, bk, wv, bv, wo, bo, e, f, w1, b1, w2, b2,
     g1, be1, g2, be2) = params

    H = num_heads
    Dh = D // H
    Kp = e.shape[1]
    N = B * S
    BHK = B * H * Kp
    dff = w1.shape[1]
    scale = 1.0 / jnp.sqrt(jnp.float32(Dh))

    bf16 = lambda a: a.astype(jnp.bfloat16)

    # ---- slab 1: fused attention weights [D, 4D] bf16 (softmax scale folded) --
    w_attn = bf16(jnp.concatenate([wq * scale, wk, wv, wo], axis=1))

    # ---- slab 2: biases + LayerNorm params, one f32 slab -----------------------
    Wb = max(3 * D, dff)
    def _row(vec):
        r = jnp.reshape(vec, (1, -1)).astype(jnp.float32)
        return jnp.pad(r, ((0, 0), (0, Wb - r.shape[1])))
    qkv_bias = jnp.concatenate([jnp.ravel(bq) * scale, jnp.ravel(bk), jnp.ravel(bv)])
    bias_slab = jnp.concatenate(
        [_row(qkv_bias), _row(bo), _row(b2), _row(g1), _row(be1), _row(g2), _row(be2),
         _row(b1)], axis=0)                                                    # [8, Wb]

    # ---- slab 3: batch-block-diagonal E/F, replicated over heads ---------------
    e_big = jnp.kron(jnp.eye(B, dtype=jnp.float32), jnp.tile(e, (1, H)))       # [N, BHK]
    f_big = jnp.kron(jnp.eye(B, dtype=jnp.float32), jnp.tile(f, (1, H)))       # [N, BHK]
    ef_slab = bf16(jnp.concatenate([e_big, f_big], axis=1))                    # [N, 2*BHK]

    # ---- slab 4: static masks (hoisted out of the kernel) ----------------------
    d_head = jnp.arange(D) // Dh
    c_head = (jnp.arange(BHK) // Kp) % H
    k_mask = (d_head[:, None] == c_head[None, :]).astype(jnp.float32)          # [D, BHK]
    v_mask = (c_head[:, None] == d_head[None, :]).astype(jnp.float32)          # [BHK, D]
    add_mask = jnp.where(
        (jnp.arange(N)[:, None] // S) == (jnp.arange(BHK)[None, :] // (H * Kp)),
        0.0, -1e9).astype(jnp.float32)                                          # [N, BHK]
    Wm = max(D, BHK)
    _pad = lambda a: jnp.pad(a, ((0, 0), (0, Wm - a.shape[1])))
    mask_slab = bf16(jnp.concatenate([_pad(k_mask), _pad(v_mask), _pad(add_mask)],
                                     axis=0))                                   # [D+BHK+N, Wm]

    # ---- slab 5: FFN weights --------------------------------------------------
    Wf = max(D, dff)
    ffn_slab = bf16(jnp.concatenate(
        [jnp.pad(w1, ((0, 0), (0, Wf - dff))),
         jnp.pad(w2, ((0, 0), (0, Wf - D)))], axis=0))                           # [D+dff, Wf]

    x2d = x.reshape(N, D)
    kernel = functools.partial(encoder_layer_kernel, d_model=D, dim_ff=dff, bhk=BHK)
    vmem = pl.BlockSpec(memory_space=pltpu.MemorySpace.VMEM)

    out = pl.pallas_call(
        kernel,
        out_shape=jax.ShapeDtypeStruct((N, D), jnp.float32),
        in_specs=[vmem] * 6,
        out_specs=vmem,
    )(x2d, w_attn, bias_slab, ef_slab, mask_slab, ffn_slab)
    return out.reshape(B, S, D)


def reference_forward(x, params, num_heads):
    """Pure-JAX f32 reference of the same math (kernel uses bf16 MXU operands)."""
    (wq, bq, wk, bk, wv, bv, wo, bo, e, f, w1, b1, w2, b2,
     g1, be1, g2, be2) = params
    B, S, D = x.shape
    Dh = D // num_heads

    def ln(t, g, b, eps=1e-5):
        m = jnp.mean(t, axis=-1, keepdims=True)
        v = jnp.mean((t - m) ** 2, axis=-1, keepdims=True)
        return (t - m) / jnp.sqrt(v + eps) * g + b

    q = x @ wq + bq
    k = x @ wk + bk
    v = x @ wv + bv
    kp = jnp.einsum("sk,bsd->bkd", e, k)
    vp = jnp.einsum("sk,bsd->bkd", f, v)
    qh = q.reshape(B, S, num_heads, Dh)
    khh = kp.reshape(B, -1, num_heads, Dh)
    vhh = vp.reshape(B, -1, num_heads, Dh)
    scores = jnp.einsum("bshd,bkhd->bhsk", qh, khh) / jnp.sqrt(jnp.float32(Dh))
    p = jax.nn.softmax(scores, axis=-1)
    o = jnp.einsum("bhsk,bkhd->bshd", p, vhh).reshape(B, S, D)
    attn = o @ wo + bo
    h1 = ln(x + attn, g1, be1)
    ff = jnp.maximum(h1 @ w1 + b1, 0.0) @ w2 + b2
    return ln(h1 + ff, g2, be2)


if __name__ == "__main__":
    B, S, D = 2, 8, 32          # batch, seq, d_model
    num_heads = 4
    dim_ff = 64
    k_proj = 4                  # Linformer projected sequence length

    key = jax.random.PRNGKey(0)
    keys = jax.random.split(key, 16)

    def rnd(k, shape, scale=0.1):
        return (scale * jax.random.normal(k, shape)).astype(jnp.float32)

    # Linear weights stored as [in, out] (equivalent to PyTorch's x @ W.T with W:[out,in]).
    wq, bq = rnd(keys[0], (D, D)), rnd(keys[1], (1, D))
    wk, bk = rnd(keys[2], (D, D)), rnd(keys[3], (1, D))
    wv, bv = rnd(keys[4], (D, D)), rnd(keys[5], (1, D))
    wo, bo = rnd(keys[6], (D, D)), rnd(keys[7], (1, D))
    e = rnd(keys[8], (S, k_proj))          # Linformer E (key seq projection)
    f = rnd(keys[9], (S, k_proj))          # Linformer F (value seq projection)
    w1, b1 = rnd(keys[10], (D, dim_ff)), rnd(keys[11], (1, dim_ff))
    w2, b2 = rnd(keys[12], (dim_ff, D)), rnd(keys[13], (1, D))
    g1, be1 = jnp.ones((1, D), jnp.float32), jnp.zeros((1, D), jnp.float32)
    g2, be2 = jnp.ones((1, D), jnp.float32), jnp.zeros((1, D), jnp.float32)

    params = [wq, bq, wk, bk, wv, bv, wo, bo, e, f, w1, b1, w2, b2, g1, be1, g2, be2]

    x = rnd(keys[14], (B, S, D), scale=1.0)

    out = sign_language_encoder_layer(x, params, num_heads)
    out = jax.block_until_ready(out)

    ref = reference_forward(x, params, num_heads)
    assert out.shape == (B, S, D)
    # Kernel uses bf16 MXU operands + approx reciprocal; compare against f32 reference
    # with a correspondingly relaxed tolerance.
    assert jnp.allclose(out, ref, atol=5e-2, rtol=5e-2), "mismatch vs JAX reference"

    print("KERNEL_OK")
</pallas_src>

<mosaic_0001>
module attributes {stable_mosaic.version = 11 : i64} {
  func.func @encoder_layer_kernel(%arg0: memref<16x32xf32, #tpu.memory_space<vmem>>, %arg1: memref<32x128xbf16, #tpu.memory_space<vmem>>, %arg2: memref<8x96xf32, #tpu.memory_space<vmem>>, %arg3: memref<16x64xbf16, #tpu.memory_space<vmem>>, %arg4: memref<80x32xbf16, #tpu.memory_space<vmem>>, %arg5: memref<96x64xbf16, #tpu.memory_space<vmem>>, %arg6: memref<16x32xf32, #tpu.memory_space<vmem>>) attributes {dimension_semantics = [], scalar_prefetch = 0 : i64, scratch_operands = 0 : i64, tpu.core_type = #tpu.core_type<tc>} {
    %c0 = arith.constant 0 : index
    %c0_0 = arith.constant 0 : index
    %0 = vector.load %arg0[%c0, %c0_0] : memref<16x32xf32, #tpu.memory_space<vmem>>, vector<16x32xf32>
    %1 = arith.truncf %0 : vector<16x32xf32> to vector<16x32xbf16>
    %c0_1 = arith.constant 0 : index
    %c0_2 = arith.constant 0 : index
    %2 = vector.load %arg1[%c0_1, %c0_2] : memref<32x128xbf16, #tpu.memory_space<vmem>>, vector<32x96xbf16>
    %cst = arith.constant dense<0.000000e+00> : vector<16x96xf32>
    %3 = tpu.matmul %1, %2, %cst {dimension_numbers = #tpu.dot_dimension_numbers<[1], [0], [0], [1], [0, 0, 1, 1], [], []>} : vector<16x32xbf16>, vector<32x96xbf16>, vector<16x96xf32> -> vector<16x96xf32>
    %c0_3 = arith.constant 0 : index
    %c0_4 = arith.constant 0 : index
    %4 = vector.load %arg2[%c0_3, %c0_4] : memref<8x96xf32, #tpu.memory_space<vmem>>, vector<1x96xf32>
    %5 = vector.broadcast %4 : vector<1x96xf32> to vector<16x96xf32>
    %6 = arith.addf %3, %5 : vector<16x96xf32>
    %7 = vector.extract_strided_slice %6 {offsets = [0, 0], sizes = [16, 32], strides = [1, 1]} : vector<16x96xf32> to vector<16x32xf32>
    %8 = arith.truncf %7 : vector<16x32xf32> to vector<16x32xbf16>
    %9 = vector.extract_strided_slice %6 {offsets = [0, 32], sizes = [16, 32], strides = [1, 1]} : vector<16x96xf32> to vector<16x32xf32>
    %10 = arith.truncf %9 : vector<16x32xf32> to vector<16x32xbf16>
    %11 = vector.extract_strided_slice %6 {offsets = [0, 64], sizes = [16, 32], strides = [1, 1]} : vector<16x96xf32> to vector<16x32xf32>
    %12 = arith.truncf %11 : vector<16x32xf32> to vector<16x32xbf16>
    %c0_5 = arith.constant 0 : index
    %c0_6 = arith.constant 0 : index
    %13 = vector.load %arg3[%c0_5, %c0_6] : memref<16x64xbf16, #tpu.memory_space<vmem>>, vector<16x32xbf16>
    %cst_7 = arith.constant dense<0.000000e+00> : vector<32x32xf32>
    %14 = tpu.matmul %10, %13, %cst_7 {dimension_numbers = #tpu.dot_dimension_numbers<[0], [0], [1], [1], [0, 1, 1, 1], [], []>} : vector<16x32xbf16>, vector<16x32xbf16>, vector<32x32xf32> -> vector<32x32xf32>
    %c0_8 = arith.constant 0 : index
    %c32 = arith.constant 32 : index
    %15 = vector.load %arg3[%c0_8, %c32] : memref<16x64xbf16, #tpu.memory_space<vmem>>, vector<16x32xbf16>
    %cst_9 = arith.constant dense<0.000000e+00> : vector<32x32xf32>
    %16 = tpu.matmul %15, %12, %cst_9 {dimension_numbers = #tpu.dot_dimension_numbers<[0], [0], [1], [1], [0, 1, 1, 1], [], []>} : vector<16x32xbf16>, vector<16x32xbf16>, vector<32x32xf32> -> vector<32x32xf32>
    %c0_10 = arith.constant 0 : index
    %c0_11 = arith.constant 0 : index
    %17 = vector.load %arg4[%c0_10, %c0_11] : memref<80x32xbf16, #tpu.memory_space<vmem>>, vector<32x32xbf16>
    %c32_12 = arith.constant 32 : index
    %c0_13 = arith.constant 0 : index
    %18 = vector.load %arg4[%c32_12, %c0_13] : memref<80x32xbf16, #tpu.memory_space<vmem>>, vector<32x32xbf16>
    %c64 = arith.constant 64 : index
    %c0_14 = arith.constant 0 : index
    %19 = vector.load %arg4[%c64, %c0_14] : memref<80x32xbf16, #tpu.memory_space<vmem>>, vector<16x32xbf16>
    %20 = arith.extf %17 : vector<32x32xbf16> to vector<32x32xf32>
    %21 = arith.mulf %14, %20 : vector<32x32xf32>
    %22 = arith.truncf %21 : vector<32x32xf32> to vector<32x32xbf16>
    %23 = arith.extf %18 : vector<32x32xbf16> to vector<32x32xf32>
    %24 = arith.mulf %16, %23 : vector<32x32xf32>
    %25 = arith.truncf %24 : vector<32x32xf32> to vector<32x32xbf16>
    %cst_15 = arith.constant dense<0.000000e+00> : vector<16x32xf32>
    %26 = tpu.matmul %8, %22, %cst_15 {dimension_numbers = #tpu.dot_dimension_numbers<[1], [0], [0], [1], [0, 0, 1, 1], [], []>} : vector<16x32xbf16>, vector<32x32xbf16>, vector<16x32xf32> -> vector<16x32xf32>
    %27 = arith.extf %19 : vector<16x32xbf16> to vector<16x32xf32>
    %28 = arith.addf %26, %27 : vector<16x32xf32>
    %cst_16 = arith.constant dense<0xFF800000> : vector<16xf32>
    %29 = vector.multi_reduction <maximumf>, %28, %cst_16 [1] : vector<16x32xf32> to vector<16xf32>
    %30 = vector.shape_cast %29 : vector<16xf32> to vector<16x1xf32>
    %31 = vector.broadcast %30 : vector<16x1xf32> to vector<16x32xf32>
    %32 = arith.subf %28, %31 : vector<16x32xf32>
    %33 = math.exp %32 : vector<16x32xf32>
    %34 = arith.truncf %33 : vector<16x32xf32> to vector<16x32xbf16>
    %cst_17 = arith.constant dense<0.000000e+00> : vector<16x32xf32>
    %35 = tpu.matmul %34, %25, %cst_17 {dimension_numbers = #tpu.dot_dimension_numbers<[1], [0], [0], [1], [0, 0, 1, 1], [], []>} : vector<16x32xbf16>, vector<32x32xbf16>, vector<16x32xf32> -> vector<16x32xf32>
    %cst_18 = arith.constant dense<0.000000e+00> : vector<16x32xf32>
    %36 = tpu.matmul %34, %18, %cst_18 {dimension_numbers = #tpu.dot_dimension_numbers<[1], [0], [0], [1], [0, 0, 1, 1], [], []>} : vector<16x32xbf16>, vector<32x32xbf16>, vector<16x32xf32> -> vector<16x32xf32>
    %cst_19 = arith.constant 1.000000e-30 : f32
    %37 = vector.broadcast %cst_19 : f32 to vector<16x32xf32>
    %38 = arith.addf %36, %37 : vector<16x32xf32>
    %39 = tpu.reciprocal %38 {approx = true} : vector<16x32xf32> -> vector<16x32xf32>
    %40 = arith.mulf %35, %39 : vector<16x32xf32>
    %41 = arith.truncf %40 : vector<16x32xf32> to vector<16x32xbf16>
    %c0_20 = arith.constant 0 : index
    %c96 = arith.constant 96 : index
    %42 = vector.load %arg1[%c0_20, %c96] : memref<32x128xbf16, #tpu.memory_space<vmem>>, vector<32x32xbf16>
    %cst_21 = arith.constant dense<0.000000e+00> : vector<16x32xf32>
    %43 = tpu.matmul %41, %42, %cst_21 {dimension_numbers = #tpu.dot_dimension_numbers<[1], [0], [0], [1], [0, 0, 1, 1], [], []>} : vector<16x32xbf16>, vector<32x32xbf16>, vector<16x32xf32> -> vector<16x32xf32>
    %c1 = arith.constant 1 : index
    %c0_22 = arith.constant 0 : index
    %44 = vector.load %arg2[%c1, %c0_22] : memref<8x96xf32, #tpu.memory_space<vmem>>, vector<1x32xf32>
    %45 = vector.broadcast %44 : vector<1x32xf32> to vector<16x32xf32>
    %46 = arith.addf %43, %45 : vector<16x32xf32>
    %47 = arith.addf %0, %46 : vector<16x32xf32>
    %c3 = arith.constant 3 : index
    %c0_23 = arith.constant 0 : index
    %48 = vector.load %arg2[%c3, %c0_23] : memref<8x96xf32, #tpu.memory_space<vmem>>, vector<1x32xf32>
    %c4 = arith.constant 4 : index
    %c0_24 = arith.constant 0 : index
    %49 = vector.load %arg2[%c4, %c0_24] : memref<8x96xf32, #tpu.memory_space<vmem>>, vector<1x32xf32>
    %cst_25 = arith.constant dense<0.000000e+00> : vector<16xf32>
    %50 = vector.multi_reduction <add>, %47, %cst_25 [1] : vector<16x32xf32> to vector<16xf32>
    %51 = vector.shape_cast %50 : vector<16xf32> to vector<16x1xf32>
    %cst_26 = arith.constant 3.200000e+01 : f32
    %52 = vector.broadcast %cst_26 : f32 to vector<16x1xf32>
    %53 = arith.divf %51, %52 : vector<16x1xf32>
    %54 = vector.broadcast %53 : vector<16x1xf32> to vector<16x32xf32>
    %55 = arith.subf %47, %54 : vector<16x32xf32>
    %56 = arith.mulf %55, %55 : vector<16x32xf32>
    %cst_27 = arith.constant dense<0.000000e+00> : vector<16xf32>
    %57 = vector.multi_reduction <add>, %56, %cst_27 [1] : vector<16x32xf32> to vector<16xf32>
    %58 = vector.shape_cast %57 : vector<16xf32> to vector<16x1xf32>
    %cst_28 = arith.constant 3.200000e+01 : f32
    %59 = vector.broadcast %cst_28 : f32 to vector<16x1xf32>
    %60 = arith.divf %58, %59 : vector<16x1xf32>
    %cst_29 = arith.constant 9.99999974E-6 : f32
    %61 = vector.broadcast %cst_29 : f32 to vector<16x1xf32>
    %62 = arith.addf %60, %61 : vector<16x1xf32>
    %63 = math.rsqrt %62 : vector<16x1xf32>
    %64 = vector.broadcast %63 : vector<16x1xf32> to vector<16x32xf32>
    %65 = arith.mulf %55, %64 : vector<16x32xf32>
    %66 = vector.broadcast %48 : vector<1x32xf32> to vector<16x32xf32>
    %67 = arith.mulf %65, %66 : vector<16x32xf32>
    %68 = vector.broadcast %49 : vector<1x32xf32> to vector<16x32xf32>
    %69 = arith.addf %67, %68 : vector<16x32xf32>
    %70 = arith.truncf %69 : vector<16x32xf32> to vector<16x32xbf16>
    %c0_30 = arith.constant 0 : index
    %c0_31 = arith.constant 0 : index
    %71 = vector.load %arg5[%c0_30, %c0_31] : memref<96x64xbf16, #tpu.memory_space<vmem>>, vector<32x64xbf16>
    %cst_32 = arith.constant dense<0.000000e+00> : vector<16x64xf32>
    %72 = tpu.matmul %70, %71, %cst_32 {dimension_numbers = #tpu.dot_dimension_numbers<[1], [0], [0], [1], [0, 0, 1, 1], [], []>} : vector<16x32xbf16>, vector<32x64xbf16>, vector<16x64xf32> -> vector<16x64xf32>
    %c7 = arith.constant 7 : index
    %c0_33 = arith.constant 0 : index
    %73 = vector.load %arg2[%c7, %c0_33] : memref<8x96xf32, #tpu.memory_space<vmem>>, vector<1x64xf32>
    %74 = vector.broadcast %73 : vector<1x64xf32> to vector<16x64xf32>
    %75 = arith.addf %72, %74 : vector<16x64xf32>
    %cst_34 = arith.constant 0.000000e+00 : f32
    %76 = vector.broadcast %cst_34 : f32 to vector<16x64xf32>
    %77 = arith.maximumf %75, %76 : vector<16x64xf32>
    %78 = arith.truncf %77 : vector<16x64xf32> to vector<16x64xbf16>
    %c32_35 = arith.constant 32 : index
    %c0_36 = arith.constant 0 : index
    %79 = vector.load %arg5[%c32_35, %c0_36] : memref<96x64xbf16, #tpu.memory_space<vmem>>, vector<64x32xbf16>
    %cst_37 = arith.constant dense<0.000000e+00> : vector<16x32xf32>
    %80 = tpu.matmul %78, %79, %cst_37 {dimension_numbers = #tpu.dot_dimension_numbers<[1], [0], [0], [1], [0, 0, 1, 1], [], []>} : vector<16x64xbf16>, vector<64x32xbf16>, vector<16x32xf32> -> vector<16x32xf32>
    %c2 = arith.constant 2 : index
    %c0_38 = arith.constant 0 : index
    %81 = vector.load %arg2[%c2, %c0_38] : memref<8x96xf32, #tpu.memory_space<vmem>>, vector<1x32xf32>
    %82 = vector.broadcast %81 : vector<1x32xf32> to vector<16x32xf32>
    %83 = arith.addf %80, %82 : vector<16x32xf32>
    %84 = arith.addf %69, %83 : vector<16x32xf32>
    %c5 = arith.constant 5 : index
    %c0_39 = arith.constant 0 : index
    %85 = vector.load %arg2[%c5, %c0_39] : memref<8x96xf32, #tpu.memory_space<vmem>>, vector<1x32xf32>
    %c6 = arith.constant 6 : index
    %c0_40 = arith.constant 0 : index
    %86 = vector.load %arg2[%c6, %c0_40] : memref<8x96xf32, #tpu.memory_space<vmem>>, vector<1x32xf32>
    %cst_41 = arith.constant dense<0.000000e+00> : vector<16xf32>
    %87 = vector.multi_reduction <add>, %84, %cst_41 [1] : vector<16x32xf32> to vector<16xf32>
    %88 = vector.shape_cast %87 : vector<16xf32> to vector<16x1xf32>
    %cst_42 = arith.constant 3.200000e+01 : f32
    %89 = vector.broadcast %cst_42 : f32 to vector<16x1xf32>
    %90 = arith.divf %88, %89 : vector<16x1xf32>
    %91 = vector.broadcast %90 : vector<16x1xf32> to vector<16x32xf32>
    %92 = arith.subf %84, %91 : vector<16x32xf32>
    %93 = arith.mulf %92, %92 : vector<16x32xf32>
    %cst_43 = arith.constant dense<0.000000e+00> : vector<16xf32>
    %94 = vector.multi_reduction <add>, %93, %cst_43 [1] : vector<16x32xf32> to vector<16xf32>
    %95 = vector.shape_cast %94 : vector<16xf32> to vector<16x1xf32>
    %cst_44 = arith.constant 3.200000e+01 : f32
    %96 = vector.broadcast %cst_44 : f32 to vector<16x1xf32>
    %97 = arith.divf %95, %96 : vector<16x1xf32>
    %cst_45 = arith.constant 9.99999974E-6 : f32
    %98 = vector.broadcast %cst_45 : f32 to vector<16x1xf32>
    %99 = arith.addf %97, %98 : vector<16x1xf32>
    %100 = math.rsqrt %99 : vector<16x1xf32>
    %101 = vector.broadcast %100 : vector<16x1xf32> to vector<16x32xf32>
    %102 = arith.mulf %92, %101 : vector<16x32xf32>
    %103 = vector.broadcast %85 : vector<1x32xf32> to vector<16x32xf32>
    %104 = arith.mulf %102, %103 : vector<16x32xf32>
    %105 = vector.broadcast %86 : vector<1x32xf32> to vector<16x32xf32>
    %106 = arith.addf %104, %105 : vector<16x32xf32>
    %c0_46 = arith.constant 0 : index
    %c0_47 = arith.constant 0 : index
    %107 = vector.load %arg6[%c0_46, %c0_47] : memref<16x32xf32, #tpu.memory_space<vmem>>, vector<16x32xf32>
    tpu.vector_store %arg6[%c0_46, %c0_47], %106 {strides = array<i32>} : memref<16x32xf32, #tpu.memory_space<vmem>>, vector<16x32xf32>,
    return
  }
}

</mosaic_0001>

<bundles_post_ra>
// kernel: tpu_custom_call.1
= control target key start
LH: loop header
LB: loop body
LE: loop exit
PB: predicated region body
PF: predicated region fallthrough
CT: control target
= control target key end

     0   :  { %s834_s0 = inlined_call_operand.vmem [shape: f32[16,32], index: 0, kind: input, shape index: {}]   ;;  %s835_s1 = inlined_call_operand.vmem [shape: bf16[32,128], index: 1, kind: input, shape index: {}]   ;;  %s836_s2 = inlined_call_operand.vmem [shape: f32[8,96], index: 2, kind: input, shape index: {}]   ;;  %s837_s3 = inlined_call_operand.vmem [shape: bf16[16,64], index: 3, kind: input, shape index: {}]   ;;  %s838_s4 = inlined_call_operand.vmem [shape: bf16[80,32], index: 4, kind: input, shape index: {}]   ;;  %s839_s5 = inlined_call_operand.vmem [shape: bf16[96,64], index: 5, kind: input, shape index: {}]   ;;  %s840_s6 = inlined_call_operand.hbm [shape: f32[16,32], index: 6, kind: output, shape index: {}]  }
   0x1   :  { %v712_v0 = vld [vmem:[%s835_s1 + $0x8] sm:$0xff]  ;;  %v717_v1 = vld [vmem:[%s835_s1] sm:$0xff] }
   0x2   :  { %v722_v2 = vld [vmem:[%s834_s0] sm:$0xff]  ;;  %v727_v3 = vld [vmem:[%s834_s0 + $0x8] sm:$0xff]  ;;  %56 = vmatpush.bf16.msra.mxu0 %v712_v0 }
   0x3   :  { %11 = vsyncpa [#allocation3], 0  ;;  %v27_v4 = vpack.c.bf16 %v727_v3, %v722_v2  ;;  %vm46_vm0 = vcmask 261120   ;;  %v584_v5 = vld [vmem:[%s837_s3] sm:$0xff]  ;;  %s667_s30 = smov 96   ;;  %s668_s8 = smov 64  }
   0x4   :  { %119 = vrot.lane.b32.xlu1 %v584_v5, %s667_s30  ;;  %107 = vmatpush.bf16.msra.mxu1 %v584_v5  ;;  %v615_v7 = vld [vmem:[%s836_s2] ss:$0 sm:$0xff]  ;;  %vm93_vm1 = vcmask 130048   ;;  %v605_v21 = vld [vmem:[%s838_s4 + $0x8] sm:$0xff]   ;;  %v172_v39 = vld [vmem:[%s838_s4 + $0x18] sm:$0xff]   ;;  %s669_s18 = smov 32  }
   0x5   :  { %v599_v23 = vunpack.c.l.bf16 %v605_v21  ;;  %v600_v24 = vunpack.c.h.bf16 %v605_v21  ;;  %v594_v25 = vld [vmem:[%s838_s4] sm:$0xff]   ;;  %v170_v41 = vld [vmem:[%s838_s4 + $0x10] sm:$0xff]   ;;  %v188_v42 = vunpack.c.l.bf16 %v172_v39  ;;  %v189_v47 = vunpack.c.h.bf16 %v172_v39  ;;  %v586_v60 = vld [vmem:[%s838_s4 + $0x18] sm:$0xff]  ;;  %s671_s20 = smov [#allocation2]   ;;  %s515_s23 = sshll.u32 %s840_s6, 4  ;;  %s516_s23 = int_to_ptr.hbm [resolvable:$true] %s515_s23 }
   0x6   :  { %57 = vmatpush.bf16.msra.mxu0 %v717_v1  ;;  %v596_v26 = vunpack.c.h.bf16 %v594_v25  ;;  %v595_v28 = vunpack.c.l.bf16 %v594_v25  ;;  %v606_v37 = vld [vmem:[%s838_s4 + $0x20] sm:$0xff]   ;;  %v186_v45 = vunpack.c.l.bf16 %v170_v41  ;;  %v187_v46 = vunpack.c.h.bf16 %v170_v41  ;;  %v585_v61 = vld [vmem:[%s838_s4 + $0x10] sm:$0xff]  ;;  %s513_s21 = sshll.u32 %s671_s20, 4  ;;  %s673_s24 = smov 8   ;;  %s514_s21 = int_to_ptr.vmem [resolvable:$true] %s513_s21 }
   0x7   :  { %v603_v40 = vunpack.c.l.bf16 %v606_v37  ;;  %v604_v51 = vunpack.c.h.bf16 %v606_v37  ;;  %vm435_vm9 = vcmask 523264  }
   0x9   :  { %535 = vmatmul.msk.bf16.vlgmr.msra.gmra.mxu0 %vm46_vm0, %v27_v4 }
  0x76   :  { %v120_v12 = vpop.permute.xlu1 %119 }
  0x77   :  { %122 = vxpose.xlu2.c.b16.start.end [1/1] (short) (narrow) %v120_v12, 32 }
  0x86   :  { %v59_v6 = vpop.f32.mrf.mxu0 }
  0x87   :  { %v60_v9 = vadd.f32 %v615_v7, %v59_v6 }
  0x8e   :  { %v61_v8 = vpop.f32.mrf.mxu0 }
  0x8f   :  { %v62_v10 = vadd.f32 %v615_v7, %v61_v8 }
  0x91   :  { %v64_v11 = vpack.c.bf16 %v62_v10, %v60_v9 }
  0x93   :  { %138 = vrot.lane.b32.xlu1 %v64_v11, %s668_s8  ;;  %68 = vrot.lane.b32.xlu0 %v64_v11, %s667_s30 }
 0x105   :  { %v139_v13 = vpop.permute.xlu1 %138  ;;  %v69_v14 = vpop.permute.xlu0 %68 }
 0x106   :  { %154 = vmatpush.bf16.msra.mxu2 %v139_v13  ;;  %71 = vxpose.xlu0.c.b16.start.end [1/1] (short) (narrow) %v69_v14, 32 }
 0x118   :  { %v130_v18 = vpop.trf.xlu2 }
 0x119   :  { %542 = vmatmul.msk.bf16.vlgmr.msra.gmra.mxu2 %vm93_vm1, %v130_v18 }
 0x128   :  { %v131_v22 = vpop.trf.xlu2 }
 0x129   :  { %543 = vmatmul.msk.bf16.gmra.mxu2 %vm93_vm1, %v131_v22  ;;  %v616_v22 = vld [vmem:[%s836_s2 + $0x1] ss:$0 sm:$0xff] }
 0x184   :  { %280 = vrot.lane.b32.xlu0 %v712_v0, %s669_s18 }
 0x19c   :  { %v156_v35 = vpop.f32.mrf.mxu2 }
 0x19d   :  { %v190_v52 = vmul.f32 %v186_v45, %v156_v35 }
 0x1a4   :  { %v158_v36 = vpop.f32.mrf.mxu2 }
 0x1a5   :  { %v191_v53 = vmul.f32 %v187_v46, %v158_v36  ;;  %v588_v46 = vld [vmem:[%s839_s5 + $0x8] sm:$0xff] }
 0x1a6   :  { %390 = vmatpush.bf16.msrb.mxu2 %v588_v46 }
 0x1a7   :  { %v194_v58 = vpack.c.bf16 %v191_v53, %v190_v52 }
 0x1ac   :  { %v161_v38 = vpop.f32.mrf.mxu2 }
 0x1ad   :  { %v192_v49 = vmul.f32 %v188_v42, %v161_v38 }
 0x1b2   :  { %v79_v15 = vpop.trf.xlu0 }
 0x1b3   :  { %540 = vmatmul.msk.bf16.vlgmr.msra.gmra.mxu1 %vm93_vm1, %v79_v15 }
 0x1b4   :  { %v163_v50 = vpop.f32.mrf.mxu2 }
 0x1b5   :  { %v193_v54 = vmul.f32 %v189_v47, %v163_v50  ;;  %v587_v47 = vld [vmem:[%s839_s5] sm:$0xff] }
 0x1b6   :  { %391 = vmatpush.bf16.msrb.mxu2 %v587_v47 }
 0x1b7   :  { %v195_v55 = vpack.c.bf16 %v193_v54, %v192_v49 }
 0x1b9   :  { %237 = vmatpush.bf16.msrb.mxu0 %v195_v55 }
 0x1bd   :  { %238 = vmatpush.bf16.msrb.mxu0 %v194_v58 }
 0x1c2   :  { %v80_v16 = vpop.trf.xlu0 }
 0x1c3   :  { %541 = vmatmul.msk.bf16.gmra.mxu1 %vm93_vm1, %v80_v16 }
 0x1f6   :  { %v281_v7 = vpop.permute.xlu0 %280 }
 0x1f7   :  { %293 = vmatpush.bf16.msrb.mxu1 %v281_v7 }
 0x230   :  { %v109_v17 = vpop.f32.mrf.mxu1 }
 0x231   :  { %v180_v33 = vmul.f32 %v595_v28, %v109_v17 }
 0x238   :  { %v111_v19 = vpop.f32.mrf.mxu1 }
 0x239   :  { %v181_v31 = vmul.f32 %v596_v26, %v111_v19 }
 0x23b   :  { %v184_v34 = vpack.c.bf16 %v181_v31, %v180_v33  ;;  %v670_v31 = vmov 32.0  }
 0x240   :  { %v114_v20 = vpop.f32.mrf.mxu1 }
 0x241   :  { %v182_v29 = vmul.f32 %v599_v23, %v114_v20 }
 0x248   :  { %v116_v27 = vpop.f32.mrf.mxu1 }
 0x249   :  { %v183_v30 = vmul.f32 %v600_v24, %v116_v27 }
 0x24b   :  { %v185_v32 = vpack.c.bf16 %v183_v30, %v182_v29 }
 0x24d   :  { %207 = vmatpush.bf16.msra.mxu3 %v185_v32 }
 0x251   :  { %208 = vmatpush.bf16.msra.mxu3 %v184_v34 }
 0x254   :  { %544 = vmatmul.msk.bf16.vlgmr.msra.gmra.mxu3 %vm46_vm0, %v64_v11 }
 0x255   :  { %263 = vmatpush.bf16.msrb.mxu3 %v586_v60 }
 0x259   :  { %264 = vmatpush.bf16.msrb.mxu3 %v585_v61 }
 0x2d7   :  { %v210_v43 = vpop.f32.mrf.mxu3 }
 0x2d8   :  { %v211_v44 = vadd.f32 %v603_v40, %v210_v43 }
 0x2da   :  { %v215_v48 = vsel %vm46_vm0, %v211_v44, -inf }
 0x2db   :  { %216 = vmax.xlane.f32.xlu2 %v215_v48 }
 0x2df   :  { %v212_v56 = vpop.f32.mrf.mxu3 }
 0x2e0   :  { %v213_v57 = vadd.f32 %v604_v51, %v212_v56  ;;  %v592_v51 = vld [vmem:[%s839_s5 + $0x28] sm:$0xff] }
 0x2e1   :  { %443 = vmatpush.bf16.msra.mxu0 %v592_v51 }
 0x2e2   :  { %v218_v59 = vsel %vm46_vm0, %v213_v57, -inf }
 0x2e3   :  { %219 = vmax.xlane.f32.xlu1 %v218_v59 }
 0x2fc   :  { %278 = vrot.lane.b32.xlu1 %v717_v1, %s669_s18 }
 0x34e   :  { %v217_v62 = vpop.xlane.xlu2 %216 }
 0x34f   :  { %v221_v63 = vsub.f32 %v211_v44, %v217_v62 }
 0x351   :  { %v223_v4 = vmul.f32 1.442695, %v221_v63 }
 0x353   :  { %623 = vpow2.f32 %v223_v4 }
 0x356   :  { %v220_v5 = vpop.xlane.xlu1 %219 }
 0x357   :  { %v222_v6 = vsub.f32 %v213_v57, %v220_v5 }
 0x359   :  { %v225_v0 = vmul.f32 1.442695, %v222_v6  ;;  %v624_v1 = vpop.eup %623 }
 0x35b   :  { %625 = vpow2.f32 %v225_v0  ;;  %v617_v0 = vld [vmem:[%s836_s2 + $0x3] ss:$0 sm:$0xff] }
 0x361   :  { %v626_v8 = vpop.eup %625 }
 0x362   :  { %v227_v9 = vpack.c.bf16 %v626_v8, %v624_v1 }
 0x364   :  { %545 = vmatmul.msk.bf16.vlgmr.msrb.gmra.mxu0 %vm46_vm0, %v227_v9  ;;  %554 = vmatmul.msk.bf16.vlgmr.msrb.gmra.mxu3 %vm46_vm0, %v227_v9 }
 0x36e   :  { %v279_v10 = vpop.permute.xlu1 %278 }
 0x36f   :  { %294 = vmatpush.bf16.msrb.mxu1 %v279_v10 }
 0x3e1   :  { %v240_v13 = vpop.f32.mrf.mxu0 }
 0x3e7   :  { %v266_v11 = vpop.f32.mrf.mxu3 }
 0x3e8   :  { %v267_v12 = vadd.f32 1e-30, %v266_v11  ;;  %v618_v11 = vld [vmem:[%s836_s2 + $0x4] ss:$0 sm:$0xff] }
 0x3e9   :  { %v242_v18 = vpop.f32.mrf.mxu0 }
 0x3ea   :  { %627 = vrcp.f32 %v267_v12 }
 0x3ef   :  { %v268_v14 = vpop.f32.mrf.mxu3 }
 0x3f0   :  { %v269_v15 = vadd.f32 1e-30, %v268_v14  ;;  %v628_v16 = vpop.eup %627 }
 0x3f1   :  { %v273_v19 = vmul.f32 %v628_v16, %v240_v13  ;;  %v591_v16 = vld [vmem:[%s839_s5 + $0x20] sm:$0xff] }
 0x3f2   :  { %629 = vrcp.f32 %v269_v15  ;;  %444 = vmatpush.bf16.msra.mxu0 %v591_v16 }
 0x3f3   :  { %631 = vrcp.f32 %v670_v31 }
 0x3f8   :  { %v630_v17 = vpop.eup %629 }
 0x3f9   :  { %v274_v20 = vmul.f32 %v630_v17, %v242_v18  ;;  %v632_v32 = vpop.eup %631  ;;  %v590_v17 = vld [vmem:[%s839_s5 + $0x18] sm:$0xff]  ;;  %v589_v18 = vld [vmem:[%s839_s5 + $0x10] sm:$0xff] }
 0x3fa   :  { %v312_v33 = vmul.f32 32.0, %v632_v32  ;;  %vm316_vm2 = vweird.f32 %v632_v32  ;;  %445 = vmatpush.bf16.msra.mxu0 %v590_v17 }
 0x3fb   :  { %v275_v21 = vpack.c.bf16 %v274_v20, %v273_v19  ;;  %v619_v20 = vld [vmem:[%s836_s2 + $0x7] ss:$0 sm:$0xff] }
 0x3fc   :  { %v313_v34 = vsub.f32 1.0, %v312_v33 }
 0x3fd   :  { %555 = vmatmul.msk.bf16.vlgmr.msrb.gmra.mxu1 %vm46_vm0, %v275_v21 }
 0x3fe   :  { %v314_v35 = vmul.f32 %v632_v32, %v313_v34  ;;  %446 = vmatpush.bf16.msra.mxu0 %v589_v18 }
 0x400   :  { %v315_v36 = vadd.f32 %v632_v32, %v314_v35 }
 0x402   :  { %v776_v37 = vsel %vm316_vm2, %v632_v32, %v315_v36 }
 0x47a   :  { %v296_v23 = vpop.f32.mrf.mxu1 }
 0x47b   :  { %v297_v24 = vadd.f32 %v616_v22, %v296_v23 }
 0x47d   :  { %v301_v25 = vadd.f32 %v297_v24, %v722_v2 }
 0x47f   :  { %v305_v26 = vsel %vm46_vm0, %v301_v25, 0.0 }
 0x480   :  { %306 = vadd.xlane.f32.xlu1 %v305_v26 }
 0x482   :  { %v298_v27 = vpop.f32.mrf.mxu1 }
 0x483   :  { %v299_v28 = vadd.f32 %v616_v22, %v298_v27  ;;  %v620_v27 = vld [vmem:[%s836_s2 + $0x2] ss:$0 sm:$0xff] }
 0x485   :  { %v302_v29 = vadd.f32 %v299_v28, %v727_v3 }
 0x487   :  { %v308_v30 = vsel %vm46_vm0, %v302_v29, 0.0 }
 0x488   :  { %309 = vadd.xlane.f32.xlu1 %v308_v30 }
 0x4f3   :  { %v307_v2 = vpop.xlane.xlu1 %306 }
 0x4f4   :  { %v318_v38 = vmul.f32 %v776_v37, %v307_v2 }
 0x4f6   :  { %v320_v39 = vsub.f32 %v301_v25, %v318_v38 }
 0x4f8   :  { %v322_v40 = vmul.f32 %v320_v39, %v320_v39 }
 0x4fa   :  { %v324_v3 = vsel %vm46_vm0, %v322_v40, 0.0 }
 0x4fb   :  { %325 = vadd.xlane.f32.xlu1 %v324_v3  ;;  %v310_v41 = vpop.xlane.xlu1 %309 }
 0x4fc   :  { %v319_v42 = vmul.f32 %v776_v37, %v310_v41 }
 0x4fe   :  { %v321_v43 = vsub.f32 %v302_v29, %v319_v42 }
 0x500   :  { %v323_v44 = vmul.f32 %v321_v43, %v321_v43 }
 0x502   :  { %v327_v45 = vsel %vm46_vm0, %v323_v44, 0.0 }
 0x503   :  { %328 = vadd.xlane.f32.xlu2 %v327_v45 }
 0x56e   :  { %v326_v48 = vpop.xlane.xlu1 %325 }
 0x56f   :  { %v330_v49 = vmul.f32 %v326_v48, %v776_v37 }
 0x571   :  { %v332_v50 = vadd.f32 1e-05, %v330_v49 }
 0x573   :  { %633 = vrsqrt.f32 %v332_v50  ;;  %vm340_vm4 = vweird.f32 %v332_v50 }
 0x576   :  { %v329_v52 = vpop.xlane.xlu2 %328 }
 0x577   :  { %v331_v53 = vmul.f32 %v329_v52, %v776_v37 }
 0x579   :  { %v634_v54 = vpop.eup %633  ;;  %v333_v55 = vadd.f32 1e-05, %v331_v53 }
 0x57a   :  { %v335_v56 = vmul.f32 %v634_v54, %v332_v50  ;;  %vm341_vm3 = vweird.f32 %v634_v54 }
 0x57b   :  { %635 = vrsqrt.f32 %v333_v55  ;;  %vm342_vm5 = vmor %vm340_vm4, %vm341_vm3  ;;  %vm350_vm7 = vweird.f32 %v333_v55 }
 0x57c   :  { %v336_v57 = vmul.f32 %v634_v54, %v335_v56 }
 0x57e   :  { %v337_v58 = vmul.f32 0.5, %v336_v57 }
 0x580   :  { %v338_v59 = vsub.f32 1.5, %v337_v58 }
 0x581   :  { %v636_v60 = vpop.eup %635 }
 0x582   :  { %v339_v61 = vmul.f32 %v634_v54, %v338_v59  ;;  %v345_v62 = vmul.f32 %v636_v60, %v333_v55  ;;  %vm351_vm6 = vweird.f32 %v636_v60  ;;  %v621_v59 = vld [vmem:[%s836_s2 + $0x5] ss:$0 sm:$0xff] }
 0x583   :  { %vm352_vm8 = vmor %vm350_vm7, %vm351_vm6 }
 0x584   :  { %v346_v63 = vmul.f32 %v636_v60, %v345_v62  ;;  %v343_v4 = vsel %vm342_vm5, %v634_v54, %v339_v61  ;;  %v622_v62 = vld [vmem:[%s836_s2 + $0x6] ss:$0 sm:$0xff]  ;;  %s672_s2 = smov 128  }
 0x585   :  { %v354_v7 = vmul.f32 %v343_v4, %v320_v39 }
 0x586   :  { %v347_v5 = vmul.f32 0.5, %v346_v63 }
 0x587   :  { %v357_v10 = vmul.f32 %v617_v0, %v354_v7 }
 0x588   :  { %v348_v6 = vsub.f32 1.5, %v347_v5 }
 0x589   :  { %v360_v13 = vadd.f32 %v618_v11, %v357_v10 }
 0x58a   :  { %v349_v1 = vmul.f32 %v636_v60, %v348_v6 }
 0x58c   :  { %v353_v8 = vsel %vm352_vm8, %v636_v60, %v349_v1 }
 0x58d   :  { %v355_v9 = vmul.f32 %v353_v8, %v321_v43 }
 0x58f   :  { %v358_v12 = vmul.f32 %v617_v0, %v355_v9 }
 0x591   :  { %v361_v14 = vadd.f32 %v618_v11, %v358_v12 }
 0x593   :  { %v362_v15 = vpack.c.bf16 %v361_v14, %v360_v13 }
 0x595   :  { %564 = vmatmul.msk.bf16.vlgmr.msrb.gmra.mxu2 %vm46_vm0, %v362_v15 }
 0x618   :  { %v393_v19 = vpop.f32.mrf.mxu2 }
 0x619   :  { %v394_v21 = vadd.f32 %v619_v20, %v393_v19 }
 0x61b   :  { %v398_v24 = vmax.f32 %v394_v21, 0.0 }
 0x620   :  { %v395_v22 = vpop.f32.mrf.mxu2 }
 0x621   :  { %v396_v23 = vadd.f32 %v619_v20, %v395_v22 }
 0x623   :  { %v399_v25 = vmax.f32 %v396_v23, 0.0 }
 0x625   :  { %v400_v26 = vpack.c.bf16 %v399_v25, %v398_v24 }
 0x627   :  { %581 = vmatmul.msk.bf16.vlgmr.msra.gmra.mxu0 %vm435_vm9, %v400_v26 }
 0x6a4   :  { %v448_v28 = vpop.f32.mrf.mxu0 }
 0x6a5   :  { %v449_v29 = vadd.f32 %v620_v27, %v448_v28 }
 0x6a7   :  { %v453_v30 = vadd.f32 %v449_v29, %v360_v13 }
 0x6a9   :  { %v457_v31 = vsel %vm46_vm0, %v453_v30, 0.0 }
 0x6aa   :  { %458 = vadd.xlane.f32.xlu1 %v457_v31 }
 0x6ac   :  { %v450_v32 = vpop.f32.mrf.mxu0 }
 0x6ad   :  { %v451_v33 = vadd.f32 %v620_v27, %v450_v32 }
 0x6af   :  { %v454_v34 = vadd.f32 %v451_v33, %v361_v14 }
 0x6b1   :  { %v460_v35 = vsel %vm46_vm0, %v454_v34, 0.0 }
 0x6b2   :  { %461 = vadd.xlane.f32.xlu2 %v460_v35 }
 0x71d   :  { %v459_v36 = vpop.xlane.xlu1 %458 }
 0x71e   :  { %v463_v2 = vmul.f32 %v459_v36, %v776_v37 }
 0x720   :  { %v465_v38 = vsub.f32 %v453_v30, %v463_v2 }
 0x722   :  { %v467_v39 = vmul.f32 %v465_v38, %v465_v38 }
 0x724   :  { %v469_v40 = vsel %vm46_vm0, %v467_v39, 0.0 }
 0x725   :  { %v462_v3 = vpop.xlane.xlu2 %461  ;;  %470 = vadd.xlane.f32.xlu1 %v469_v40 }
 0x726   :  { %v464_v41 = vmul.f32 %v462_v3, %v776_v37 }
 0x728   :  { %v466_v42 = vsub.f32 %v454_v34, %v464_v41 }
 0x72a   :  { %v468_v43 = vmul.f32 %v466_v42, %v466_v42 }
 0x72c   :  { %v472_v44 = vsel %vm46_vm0, %v468_v43, 0.0 }
 0x72d   :  { %473 = vadd.xlane.f32.xlu2 %v472_v44 }
 0x798   :  { %v471_v45 = vpop.xlane.xlu1 %470 }
 0x799   :  { %v475_v46 = vmul.f32 %v471_v45, %v776_v37 }
 0x79b   :  { %v477_v47 = vadd.f32 1e-05, %v475_v46 }
 0x79d   :  { %637 = vrsqrt.f32 %v477_v47  ;;  %vm485_vm11 = vweird.f32 %v477_v47 }
 0x7a0   :  { %v474_v48 = vpop.xlane.xlu2 %473 }
 0x7a1   :  { %v476_v49 = vmul.f32 %v474_v48, %v776_v37 }
 0x7a3   :  { %v638_v50 = vpop.eup %637  ;;  %v478_v51 = vadd.f32 1e-05, %v476_v49 }
 0x7a4   :  { %v480_v52 = vmul.f32 %v638_v50, %v477_v47  ;;  %vm486_vm10 = vweird.f32 %v638_v50 }
 0x7a5   :  { %639 = vrsqrt.f32 %v478_v51  ;;  %vm487_vm12 = vmor %vm485_vm11, %vm486_vm10  ;;  %vm495_vm14 = vweird.f32 %v478_v51 }
 0x7a6   :  { %v481_v53 = vmul.f32 %v638_v50, %v480_v52 }
 0x7a8   :  { %v482_v54 = vmul.f32 0.5, %v481_v53 }
 0x7aa   :  { %v483_v55 = vsub.f32 1.5, %v482_v54 }
 0x7ab   :  { %v640_v56 = vpop.eup %639 }
 0x7ac   :  { %v484_v57 = vmul.f32 %v638_v50, %v483_v55  ;;  %v490_v58 = vmul.f32 %v640_v56, %v478_v51  ;;  %vm496_vm13 = vweird.f32 %v640_v56 }
 0x7ad   :  { %vm497_vm15 = vmor %vm495_vm14, %vm496_vm13 }
 0x7ae   :  { %v488_v60 = vsel %vm487_vm12, %v638_v50, %v484_v57  ;;  %v491_v61 = vmul.f32 %v640_v56, %v490_v58 }
 0x7af   :  { %v499_v37 = vmul.f32 %v488_v60, %v465_v38 }
 0x7b0   :  { %v492_v63 = vmul.f32 0.5, %v491_v61 }
 0x7b1   :  { %v502_v4 = vmul.f32 %v621_v59, %v499_v37 }
 0x7b2   :  { %v493_v5 = vsub.f32 1.5, %v492_v63 }
 0x7b3   :  { %v505_v6 = vadd.f32 %v622_v62, %v502_v4 }
 0x7b4   :  { %v494_v7 = vmul.f32 %v640_v56, %v493_v5 }
 0x7b5   :  { %507 = vst.msk [vmem:[#allocation2] sm:$0xff] %vm46_vm0, %v505_v6 }
 0x7b6   :  { %v498_v0 = vsel %vm497_vm15, %v640_v56, %v494_v7 }
 0x7b7   :  { %v500_v1 = vmul.f32 %v498_v0, %v466_v42 }
 0x7b9   :  { %v503_v8 = vmul.f32 %v621_v59, %v500_v1 }
 0x7bb   :  { %v506_v9 = vadd.f32 %v622_v62, %v503_v8 }
 0x7bd   :  { %508 = vst.msk [vmem:[#allocation2 + $0x8] sm:$0xff] %vm46_vm0, %v506_v9 }
 0x7be   :  { %521 = dma.vmem_to_hbm [thread:$0]  %s514_s21, 256, %s516_s23, [#allocation3], %s672_s2, %s672_s2, %s673_s24  }
 0x7bf   :  { %665 = dma.done.wait [#allocation3], 256  }
 0x7c0   :  { %666 = vsyncadd [#allocation3], 4294967040 }
 0x7c1   :  { %526 = vsyncpa [#allocation3], 1 }

</bundles_post_ra>
